<compile_context>
chip_gen: v7x
topology: tpu7x:2x2x1
jax: 0.10.0
libtpu: 0.0.40
codegen_flags: <defaults>
</compile_context>

<pallas_src>
import numpy as np
import jax
import jax.numpy as jnp
from jax.experimental import pallas as pl
from jax.experimental.pallas import tpu as pltpu


MAX_TILE_LANES = 2048  # lane-tile cap; (KKC+1)*TILE bf16 + Cout*TILE f32, double-buffered, ~0.5 MiB


def _dconvt_kernel(w_ref, patch_ref, out_ref):
    # w_ref:     (Cout, KKC+1)     bf16  (mix-folded weights with bias column appended)
    # patch_ref: (1, KKC+1, TILE)  bf16  (im2col columns with a ones-row appended)
    # out_ref:   (1, Cout, TILE)   f32
    out_ref[0] = jnp.dot(
        w_ref[...], patch_ref[0], preferred_element_type=jnp.float32
    ).astype(out_ref.dtype)


def dynamic_conv_transpose(x_nchw, conv_w, conv_b, mix_w, stride):
    """Weighted sum of ConvTranspose2d's (matches the PyTorch module's forward).

    x_nchw: (N, Cin, H, W) float32        (PyTorch NCHW input)
    conv_w: (num_cnvs, Cin, Cout, k, k)   (PyTorch ConvTranspose2d weight layout)
    conv_b: (num_cnvs, Cout)
    mix_w : (num_cnvs, 1)
    Returns (N, Cout, Ho, Wo) float32 with Ho = (H-1)*stride + k (padding=0, like PyTorch).
    """
    num_cnvs, Cin, Cout, k, _ = conv_w.shape
    N, _, H, W = x_nchw.shape
    s = stride
    Ho = (H - 1) * s + k
    Wo = (W - 1) * s + k
    P = Ho * Wo
    KKC = k * k * Cin
    KKC1 = KKC + 1                       # +1 row of ones for the folded bias

    # ---- glue (pure data movement, channels-first, bf16 from the start) ----
    x_bf = x_nchw.astype(jnp.bfloat16)

    Hd, Wd = (H - 1) * s + 1, (W - 1) * s + 1
    pad = k - 1
    Hp, Wp = Hd + 2 * pad, Wd + 2 * pad
    # dilation + (k-1) zero padding in a single scatter into a zero slab
    x_pad = jnp.zeros((N, Cin, Hp, Wp), jnp.bfloat16).at[
        :, :, pad:pad + Hd:s, pad:pad + Wd:s].set(x_bf)

    # im2col, contraction ordering = (kh, kw, ci) to match the weight reshape below
    cols = [x_pad[:, :, kh:kh + Ho, kw:kw + Wo] for kh in range(k) for kw in range(k)]
    patches = jnp.stack(cols, axis=1).reshape(N, KKC, P)            # (N, KKC, P) bf16

    # lane padding to a multiple of 128 (zero-filled) + ones-row for the folded bias
    Ppad = ((P + 127) // 128) * 128
    patches = jnp.pad(patches, ((0, 0), (0, 0), (0, Ppad - P)))
    ones_row = jnp.zeros((N, 1, Ppad), jnp.bfloat16).at[:, :, :P].set(1.0)
    patches = jnp.concatenate([patches, ones_row], axis=1)          # (N, KKC1, Ppad)

    # Flipped kernels: Wf[i, kh, kw, ci, co] = W[i, ci, co, k-1-kh, k-1-kw]
    w_flip = jnp.flip(conv_w, axis=(-2, -1)).transpose(0, 3, 4, 1, 2)
    w_mat = w_flip.reshape(num_cnvs, KKC, Cout).astype(jnp.float32)
    mix = mix_w.reshape(num_cnvs).astype(jnp.float32)

    # mix fold (one GEMM instead of num_cnvs) + bias fold (append bias as an extra column)
    w_mix = jnp.einsum('i,ikc->ck', mix, w_mat)                      # (Cout, KKC)
    b_mix = jnp.einsum('i,ic->c', mix, conv_b.astype(jnp.float32))   # (Cout,)
    w_aug = jnp.concatenate([w_mix, b_mix[:, None]], axis=1).astype(jnp.bfloat16)  # (Cout, KKC1)

    # ---- lane-tile selection: largest 128-multiple divisor of Ppad <= MAX_TILE_LANES ----
    m = Ppad // 128
    d = max(dd for dd in range(1, m + 1) if m % dd == 0 and dd * 128 <= MAX_TILE_LANES)
    tile = d * 128
    tiles_per_batch = Ppad // tile

    cost = pl.CostEstimate(
        flops=2 * Cout * KKC1 * N * Ppad,
        transcendentals=0,
        bytes_accessed=int(patches.size) * 2 + int(w_aug.size) * 2 + N * Cout * Ppad * 4,
    )

    out = pl.pallas_call(
        _dconvt_kernel,
        out_shape=jax.ShapeDtypeStruct((N, Cout, Ppad), jnp.float32),
        grid=(N, tiles_per_batch),
        in_specs=[
            pl.BlockSpec((Cout, KKC1), lambda n, j: (0, 0)),         # folded weights+bias (bf16)
            pl.BlockSpec((1, KKC1, tile), lambda n, j: (n, 0, j)),   # patches+ones (bf16)
        ],
        out_specs=pl.BlockSpec((1, Cout, tile), lambda n, j: (n, 0, j)),
        compiler_params=pltpu.CompilerParams(
            dimension_semantics=("parallel", "parallel")),
        cost_estimate=cost,
    )(w_aug, patches)

    # (N, Cout, Ppad) is NCHW-flat with zero lane padding at the tail: slice + reshape only.
    return out[:, :, :P].reshape(N, Cout, Ho, Wo)


def reference_numpy(x, conv_w, conv_b, mix_w, s):
    """Direct NumPy replica of the PyTorch forward (sum_i w_i * ConvTranspose2d_i(x)), f32."""
    N, Cin, H, W = x.shape
    num_cnvs, _, Cout, k, _ = conv_w.shape
    Ho, Wo = (H - 1) * s + k, (W - 1) * s + k
    feats = np.zeros((N, Cout, Ho, Wo), np.float32)
    for i in range(num_cnvs):
        out_i = np.zeros((N, Cout, Ho, Wo), np.float32)
        for h in range(H):
            for w in range(W):
                contrib = np.einsum('nc,cokl->nokl', x[:, :, h, w], conv_w[i])
                out_i[:, :, h * s:h * s + k, w * s:w * s + k] += contrib
        out_i += conv_b[i][None, :, None, None]
        feats += mix_w[i, 0] * out_i
    return feats


if __name__ == "__main__":
    # Small shapes consistent with the module: in_ch=4, out_ch=8, k=3, stride=2, num_cnvs=3
    N, Cin, H, W = 2, 4, 16, 16
    Cout, k, stride, num_cnvs = 8, 3, 2, 3

    key = jax.random.PRNGKey(0)
    kx, kw, kb = jax.random.split(key, 3)
    x = jax.random.normal(kx, (N, Cin, H, W), dtype=jnp.float32)
    conv_w = 0.1 * jax.random.normal(kw, (num_cnvs, Cin, Cout, k, k), dtype=jnp.float32)
    conv_b = 0.1 * jax.random.normal(kb, (num_cnvs, Cout), dtype=jnp.float32)
    mix_w = (1.0 / num_cnvs) * jnp.ones((num_cnvs, 1), dtype=jnp.float32)  # matches __init__

    fwd = jax.jit(lambda xx, ww, bb, mm: dynamic_conv_transpose(xx, ww, bb, mm, stride))
    out = jax.block_until_ready(fwd(x, conv_w, conv_b, mix_w))

    ref = reference_numpy(np.asarray(x), np.asarray(conv_w), np.asarray(conv_b),
                          np.asarray(mix_w), stride)

    assert out.shape == ref.shape, (out.shape, ref.shape)
    # bf16 matmul inputs (f32 accumulation) -> tolerance loosened accordingly vs. the f32 ref.
    np.testing.assert_allclose(np.asarray(out), ref, rtol=2e-2, atol=2e-2)
    print("KERNEL_OK")
</pallas_src>

<mosaic_0001>
module attributes {stable_mosaic.version = 11 : i64} {
  func.func @_dconvt_kernel(%arg0: i32, %arg1: i32, %arg2: memref<8x37xbf16, #tpu.memory_space<vmem>>, %arg3: memref<1x37x1152xbf16, #tpu.memory_space<vmem>>, %arg4: memref<1x8x1152xf32, #tpu.memory_space<vmem>>) attributes {dimension_semantics = [#tpu.dimension_semantics<parallel>, #tpu.dimension_semantics<parallel>], iteration_bounds = array<i64: 2, 1>, scalar_prefetch = 0 : i64, scratch_operands = 0 : i64, tpu.core_type = #tpu.core_type<tc>, window_params = [{pipeline_mode = #tpu.pipeline_mode<synchronous>, transform_indices = @transform_0, window_bounds = array<i64: 8, 37>}, {transform_indices = @transform_1, window_bounds = array<i64: 1, 37, 1152>}, {transform_indices = @transform_2, window_bounds = array<i64: 1, 8, 1152>}]} {
    %c0 = arith.constant 0 : index
    %c0_0 = arith.constant 0 : index
    %0 = vector.load %arg2[%c0, %c0_0] : memref<8x37xbf16, #tpu.memory_space<vmem>>, vector<8x37xbf16>
    %c0_1 = arith.constant 0 : index
    %c0_2 = arith.constant 0 : index
    %c0_3 = arith.constant 0 : index
    %1 = vector.load %arg3[%c0_1, %c0_2, %c0_3] : memref<1x37x1152xbf16, #tpu.memory_space<vmem>>, vector<1x37x1152xbf16>
    %2 = vector.shape_cast %1 : vector<1x37x1152xbf16> to vector<37x1152xbf16>
    %cst = arith.constant dense<0.000000e+00> : vector<8x1152xf32>
    %3 = tpu.matmul %0, %2, %cst {dimension_numbers = #tpu.dot_dimension_numbers<[1], [0], [0], [1], [0, 0, 1, 1], [], []>} : vector<8x37xbf16>, vector<37x1152xbf16>, vector<8x1152xf32> -> vector<8x1152xf32>
    %c0_4 = arith.constant 0 : index
    %c0_5 = arith.constant 0 : index
    %c0_6 = arith.constant 0 : index
    %4 = vector.load %arg4[%c0_4, %c0_5, %c0_6] : memref<1x8x1152xf32, #tpu.memory_space<vmem>>, vector<1x8x1152xf32>
    %5 = vector.shape_cast %4 : vector<1x8x1152xf32> to vector<8x1152xf32>
    %6 = vector.shape_cast %3 : vector<8x1152xf32> to vector<1x8x1152xf32>
    tpu.vector_store %arg4[%c0_4, %c0_5, %c0_6], %6 {strides = array<i32>} : memref<1x8x1152xf32, #tpu.memory_space<vmem>>, vector<1x8x1152xf32>,
    return
  }
  func.func @transform_0(%arg0: i32, %arg1: i32) -> (i32, i32) {
    %c0_i32 = arith.constant 0 : i32
    %c0_i32_0 = arith.constant 0 : i32
    %c0_i32_1 = arith.constant 0 : i32
    return %c0_i32, %c0_i32_0 : i32, i32
  }
  func.func @transform_1(%arg0: i32, %arg1: i32) -> (i32, i32, i32) {
    %c0_i32 = arith.constant 0 : i32
    %c0_i32_0 = arith.constant 0 : i32
    return %arg0, %c0_i32, %arg1 : i32, i32, i32
  }
  func.func @transform_2(%arg0: i32, %arg1: i32) -> (i32, i32, i32) {
    %c0_i32 = arith.constant 0 : i32
    %c0_i32_0 = arith.constant 0 : i32
    return %arg0, %c0_i32, %arg1 : i32, i32, i32
  }
}

</mosaic_0001>

<bundles_post_ra>
// kernel: _lambda_.1
= control target key start
LH: loop header
LB: loop body
LE: loop exit
PB: predicated region body
PF: predicated region fallthrough
CT: control target
= control target key end

     0   :  { %s823_s9 = smov 0   ;;  %s825_s10 = smov 0   ;;  %s908_s0 = inlined_call_operand.vmem [shape: bf16[8,37], index: 0, kind: input, shape index: {}]   ;;  %s909_s1 = inlined_call_operand.vmem [shape: bf16[2,37,1152], index: 1, kind: input, shape index: {}]   ;;  %s910_s2 = inlined_call_operand.vmem [shape: f32[2,8,1152], index: 2, kind: output, shape index: {}]  }
   0x1   :  { %s827_s11 = smov 0  }
   0x2 LB: > { %s24_s12 = sadd.s32 1, %s798_s10  ;;  %p664_p0 = scmp.ge.s32.totalorder %s802_s11, 1  ;;  %s802_s11 = sphi %s827_s11, %s12_s11   ;;  %s798_s10 = sphi %s825_s10, %s912_s10   ;;  %s794_s9 = sphi %s823_s9, %s911_s9  }
   0x3   : > { %p26_p1 = scmp.ge.s32.totalorder %s24_s12, 2  ;;  %p133_p2 = scmp.lt.s32.totalorder %s802_s11, 3 }
   0x5   : > { %s914_s12 = smov (%p26_p1, %s24_s12), 0  ;;  %p134_p3 = pnand %p664_p0, %p133_p2 }
   0x6   : > { %p164_p4 = scmp.lt.s32.totalorder (!%p134_p3), %s794_s9, 1  ;;  %v804_v0 = vmov (!%p134_p3), 0   ;;  %vm329_vm0 = vcmask (!%p134_p3), 1041408   ;;  %vm330_vm1 = vcmask (!%p134_p3), 1042432   ;;  %v805_v1 = vmov (!%p134_p3), 65535  }
   0x7   : > { %137 = sbr.rel (%p134_p3) target bundleno = 270 (0x10e), region = 28  ;;  %392 = vmatprep.mubr.bf16.mxu0 (!%p134_p3), %v804_v0  ;;  %433 = vmatprep.mubr.bf16.mxu1 (!%p134_p3), %v804_v0  ;;  %v331_v2 = vsel (!%p134_p3), %vm329_vm0, 4294967295, %v805_v1  ;;  %v184_v22 = vld [vmem:[%s908_s0] sm:$0xf] (!%p134_p3)  ;;  %vm325_vm2 = vcmask (!%p134_p3), 302080   ;;  %v806_v42 = vmov (!%p134_p3), 0.0  }
   0x8   : > { %v853_v5 = vsel (!%p134_p3), %vm330_vm1, %v331_v2, 0  ;;  %vm807_vm3 = vmmov (!%p134_p3), 0  }
   0xe   : > { %s916_s9 = smov (!%p164_p4, %s794_s9), 1 }
   0xf   : > { %s715_s13 = smul.u32 180, %s916_s9 }
  0x10   : > { %s716_s19 = smul.u32 72, %s916_s9 }
  0x11   : > { %s849_s16 = scalar_lea.vmem %s909_s1, %s715_s13 }
  0x12   : > { %v745_v3 = vld [vmem:[%s849_s16 + $0x4] ss:$36 sps:$4 sm:$0xff]   ;;  %v748_v6 = vld [vmem:[%s849_s16 + $0x4c] ss:$36 sps:$4 sm:$0xff]   ;;  %v759_v14 = vld [vmem:[%s849_s16 + $0x54] ss:$36 sps:$4 sm:$0xff]   ;;  %s181_s22 = scalar_lea.vmem %s910_s2, %s716_s19 }
  0x13   : > { %v747_v4 = vld [vmem:[%s849_s16] ss:$36 sps:$4 sm:$0xff]   ;;  %360 = vmatprep.subr.bf16.mxu0 %v745_v3  ;;  %v750_v7 = vld [vmem:[%s849_s16 + $0x48] ss:$36 sps:$4 sm:$0xff]   ;;  %v205_v8 = vld [vmem:[%s849_s16 + $0x90] sm:$0x77] }
  0x14   : > { %361 = vmatpush1.bf16.msra.mxu0 %v747_v4  ;;  %v686_v9 = vcombine.high %v205_v8, %v205_v8  ;;  %v685_v10 = vcombine.low %v205_v8, %v205_v8  ;;  %v753_v11 = vld [vmem:[%s849_s16 + $0xc] ss:$36 sps:$4 sm:$0xff]   ;;  %v758_v17 = vld [vmem:[%s849_s16 + $0x14] ss:$36 sps:$4 sm:$0xff]   ;;  %v207_v21 = vld [vmem:[%s849_s16 + $0xa0] sm:$0x77] }
  0x15   : > { %362 = vmatprep.subr.bf16.mxu0 %v748_v6  ;;  %v755_v12 = vld [vmem:[%s849_s16 + $0x8] ss:$36 sps:$4 sm:$0xff]   ;;  %401 = vmatprep.subr.bf16.mxu1 %v753_v11  ;;  %v761_v15 = vld [vmem:[%s849_s16 + $0x50] ss:$36 sps:$4 sm:$0xff]   ;;  %v206_v18 = vld [vmem:[%s849_s16 + $0x98] sm:$0x77]  ;;  %v690_v28 = vcombine.high %v207_v21, %v207_v21  ;;  %v689_v32 = vcombine.low %v207_v21, %v207_v21 }
  0x16   : > { %v337_v13 = vand.u32 %v686_v9, %v853_v5  ;;  %402 = vmatpush1.bf16.msra.mxu1 %v755_v12  ;;  %v334_v16 = vand.u32 %v685_v10, %v853_v5  ;;  %v688_v19 = vcombine.high %v206_v18, %v206_v18  ;;  %v687_v20 = vcombine.low %v206_v18, %v206_v18  ;;  %v756_v23 = vld [vmem:[%s849_s16 + $0x10] ss:$36 sps:$4 sm:$0xff]   ;;  %v771_v26 = vld [vmem:[%s849_s16 + $0x1c] ss:$36 sps:$4 sm:$0xff]   ;;  %v208_v29 = vld [vmem:[%s849_s16 + $0xa8] sm:$0x77] }
  0x17   : > { %403 = vmatprep.subr.bf16.mxu1 %v759_v14  ;;  %v764_v27 = vld [vmem:[%s849_s16 + $0x5c] ss:$36 sps:$4 sm:$0xff]   ;;  %v774_v33 = vld [vmem:[%s849_s16 + $0x64] ss:$36 sps:$4 sm:$0xff]   ;;  %v692_v34 = vcombine.high %v208_v29, %v208_v29  ;;  %v349_v35 = vand.u32 %v690_v28, %v853_v5  ;;  %v691_v37 = vcombine.low %v208_v29, %v208_v29  ;;  %v346_v38 = vand.u32 %v689_v32, %v853_v5 }
  0x18   : > { %363 = vmatpush1.bf16.msra.mxu0 %v750_v7  ;;  %v343_v24 = vand.u32 %v688_v19, %v853_v5  ;;  %v340_v25 = vand.u32 %v687_v20, %v853_v5  ;;  %v769_v30 = vld [vmem:[%s849_s16 + $0x18] ss:$36 sps:$4 sm:$0xff]   ;;  %v772_v36 = vld [vmem:[%s849_s16 + $0x60] ss:$36 sps:$4 sm:$0xff]   ;;  %v778_v43 = vld [vmem:[%s849_s16 + $0x68] ss:$36 sps:$4 sm:$0xff]  }
  0x19   : > { %364 = vmatprep.subr.bf16.mxu0 %v337_v13  ;;  %v762_v31 = vld [vmem:[%s849_s16 + $0x58] ss:$36 sps:$4 sm:$0xff]   ;;  %v355_v39 = vand.u32 %v692_v34, %v853_v5  ;;  %v352_v40 = vand.u32 %v691_v37, %v853_v5  ;;  %v775_v41 = vld [vmem:[%s849_s16 + $0x20] ss:$36 sps:$4 sm:$0xff]  }
  0x1a   : > { %404 = vmatpush1.bf16.msra.mxu1 %v761_v15  ;;  %v779_v44 = vld [vmem:[%s849_s16 + $0xb0] ss:$0 sps:$4 sm:$0x77]  }
  0x1b   : > { %405 = vmatprep.subr.bf16.mxu1 %v343_v24  ;;  %v358_v45 = vand.u32 %v779_v44, %v853_v5 }
  0x1c   : > { %365 = vmatpush1.bf16.msra.mxu0 %v334_v16 }
  0x1d   : > { %442 = vmatprep.subr.bf16.mxu0 %v758_v17 }
  0x1e   : > { %406 = vmatpush1.bf16.msra.mxu1 %v340_v25 }
  0x1f   : > { %694 = vmatmul.mubr.msk.bf16.vlgmr.msra.gmra.mrb[0].mxu0 %vm325_vm2, %v184_v22  ;;  %483 = vmatprep.subr.bf16.mxu1 %v771_v26 }
  0x20   : > { %443 = vmatpush1.bf16.msra.mxu0 %v756_v23  ;;  %474 = vmatprep.mubr.bf16.mxu0 %v804_v0 }
  0x21   : > { %444 = vmatprep.subr.bf16.mxu0 %v764_v27  ;;  %695 = vmatmul.mubr.msk.bf16.vlgmr.msra.gmra.mrb[0].mxu1 %vm325_vm2, %v184_v22 }
  0x22   : > { %484 = vmatpush1.bf16.msra.mxu1 %v769_v30  ;;  %515 = vmatprep.mubr.bf16.mxu1 %v804_v0 }
  0x23   : > { %485 = vmatprep.subr.bf16.mxu1 %v774_v33 }
  0x24   : > { %445 = vmatpush1.bf16.msra.mxu0 %v762_v31 }
  0x25   : > { %446 = vmatprep.subr.bf16.mxu0 %v349_v35 }
  0x26   : > { %486 = vmatpush1.bf16.msra.mxu1 %v772_v36 }
  0x27   : > { %487 = vmatprep.subr.bf16.mxu1 %v355_v39 }
  0x28   : > { %447 = vmatpush1.bf16.msra.mxu0 %v346_v38 }
  0x29   : > { %705 = vmatprep.subr.bf16.mxu0 %v806_v42 }
  0x2a   : > { %488 = vmatpush1.bf16.msra.mxu1 %v352_v40 }
  0x2b   : > { %696 = vmatmul.mubr.msk.bf16.vlgmr.msra.gmra.mrb[4].mxu0 %vm325_vm2, %v184_v22 }
  0x2c   : > { %706 = vmatpush3.bf16.msra.mxu0 %v775_v41  ;;  %711 = vmatprep.mubr.msk.bf16.mxu0 %vm807_vm3, %v806_v42 }
  0x2d   : > { %707 = vmatprep.subr.bf16.mxu0 %v806_v42  ;;  %697 = vmatmul.mubr.msk.bf16.vlgmr.msra.gmra.mrb[4].mxu1 %vm325_vm2, %v184_v22 }
  0x30   : > { %708 = vmatpush3.bf16.msra.mxu0 %v778_v43 }
  0x31   : > { %709 = vmatprep.subr.bf16.mxu0 %v806_v42 }
  0x34   : > { %710 = vmatpush3.bf16.msra.mxu0 %v358_v45 }
  0x37   : > { %712 = vmatmul.mubr.msk.bf16.vlgmr.msra.gmra.mrb[8].mxu0 %vm325_vm2, %v184_v22 }
  0xf2   : > { %v394_v46 = vpop.f32.mrb[0].mxu0 }
  0xf3   : > { %564 = vst [vmem:[%s181_s22] sm:$0xff] %v394_v46  ;;  %v396_v47 = vpop.f32.mrb[1].mxu0 }
  0xf4   : > { %565 = vst [vmem:[%s181_s22 + $0x8] sm:$0xff] %v396_v47  ;;  %v398_v48 = vpop.f32.mrb[2].mxu0  ;;  %v435_v50 = vpop.f32.mrb[0].mxu1 }
  0xf5   : > { %v399_v49 = vpop.f32.mrb[3].mxu0  ;;  %566 = vst [vmem:[%s181_s22 + $0x10] sm:$0xff] %v435_v50  ;;  %v437_v51 = vpop.f32.mrb[1].mxu1 }
  0xf6   : > { %567 = vst [vmem:[%s181_s22 + $0x18] sm:$0xff] %v437_v51  ;;  %v439_v52 = vpop.f32.mrb[2].mxu1 }
  0xf7   : > { %v440_v53 = vpop.f32.mrb[3].mxu1 }
  0xfe   : > { %v476_v54 = vpop.f32.mrb[4].mxu0 }
  0xff   : > { %568 = vst [vmem:[%s181_s22 + $0x20] sm:$0xff] %v476_v54  ;;  %v478_v55 = vpop.f32.mrb[5].mxu0 }
 0x100   : > { %569 = vst [vmem:[%s181_s22 + $0x28] sm:$0xff] %v478_v55  ;;  %v480_v56 = vpop.f32.mrb[6].mxu0  ;;  %v517_v58 = vpop.f32.mrb[4].mxu1 }
 0x101   : > { %v481_v57 = vpop.f32.mrb[7].mxu0  ;;  %570 = vst [vmem:[%s181_s22 + $0x30] sm:$0xff] %v517_v58  ;;  %v519_v59 = vpop.f32.mrb[5].mxu1 }
 0x102   : > { %571 = vst [vmem:[%s181_s22 + $0x38] sm:$0xff] %v519_v59  ;;  %v521_v60 = vpop.f32.mrb[6].mxu1 }
 0x103   : > { %v522_v61 = vpop.f32.mrb[7].mxu1 }
 0x10a   : > { %v558_v62 = vpop.f32.mrb[8].mxu0 }
 0x10b   : > { %572 = vst [vmem:[%s181_s22 + $0x40] sm:$0xff] %v558_v62  ;;  %v713_v63 = vpop.f32.mrb[9].mxu0 }
 0x10c   : > { %v561_v0 = vpop.f32.mrb[10].mxu0 }
 0x10d   : > { %v714_v1 = vpop.f32.mrb[11].mxu0 }
 0x10e PF: > { %s12_s11 = sadd.s32 1, %s802_s11   ;;  %s911_s9 = smov %s798_s10 }
 0x10f   : > { %p9_p5 = scmp.ge.s32.totalorder %s12_s11, 4   ;;  %s912_s10 = smov %s914_s12 }
 0x111   :  { %11 = sbr.rel (!%p9_p5) target bundleno = 2 (0x2), region = 58 }

</bundles_post_ra>
